<compile_context>
chip_gen: v6e
topology: v6e:2x2x1
jax: 0.10.0
libtpu: 0.0.40
codegen_flags: <defaults>
</compile_context>

<pallas_src>
import functools
import math

import jax
import jax.numpy as jnp
from jax import lax
from jax.experimental import pallas as pl
from jax.experimental.pallas import tpu as pltpu

_LANE = 128
_MAX_ROW_TILE = 2048  # soft cap on the row tile; the VMEM budget usually binds first


def _round_up(x, mult):
    return ((x + mult - 1) // mult) * mult


def _cdiv(a, b):
    return (a + b - 1) // b


def _sublane_pack(dtype):
    # rows packed per 32-bit sublane group: f32 -> 8, bf16 -> 16, int8/fp8 -> 32
    return max(8, 32 // jnp.dtype(dtype).itemsize)


@functools.lru_cache(maxsize=1)
def _vmem_capacity_bytes():
    try:
        return int(pltpu.get_tpu_info().vmem_capacity_bytes)
    except Exception:
        return 64 * 1024 * 1024  # conservative fallback (v7x per-TensorCore VMEM)


def _lie_residual_dense_kernel(x_ref, w_ref, o_ref):
    # out = x + x @ W, with W = u^T diag(a) v - v^T diag(a) u prepacked (bf16).
    x = x_ref[...]
    upd = jnp.dot(x.astype(w_ref.dtype), w_ref[...],
                  preferred_element_type=jnp.float32)
    o_ref[...] = (x.astype(jnp.float32) + upd).astype(o_ref.dtype)


def _lie_residual_lowrank_kernel(x_ref, uv_ref, w2_ref, o_ref):
    # out = x + (x . [u; v]) @ [a*v; -a*u]; both weight operands are lane-dense (2r, n).
    x = x_ref[...]
    xc = x.astype(uv_ref.dtype)
    # proj[m, s] = sum_n x[m, n] * uv[s, n]   (contract the lane dims of both operands)
    proj = lax.dot_general(xc, uv_ref[...],
                           dimension_numbers=(((1,), (1,)), ((), ())),
                           preferred_element_type=jnp.float32)
    upd = jnp.dot(proj.astype(w2_ref.dtype), w2_ref[...],
                  preferred_element_type=jnp.float32)
    o_ref[...] = (x.astype(jnp.float32) + upd).astype(o_ref.dtype)


@jax.jit
def lie_residual(x, u, v, a):
    """Apply LieResidual to x of shape (*, n)."""
    orig_shape = x.shape
    n = orig_shape[-1]
    rank = u.shape[0]
    x2 = x.reshape(-1, n)
    m = x2.shape[0]
    dtype = x2.dtype

    # Matmul operands in bf16 (MXU-native on v5e/v6e/v7x); accumulate & residual add in f32.
    compute_dtype = jnp.bfloat16 if dtype == jnp.float32 else dtype
    in_isz = jnp.dtype(dtype).itemsize
    cmp_isz = jnp.dtype(compute_dtype).itemsize

    n_lane = _round_up(n, _LANE)        # what the MXU / VMEM layout actually sees
    pack = _sublane_pack(dtype)

    # ---- dense-vs-lowrank crossover (rank aware; ~256 padded, at most 512) -----------
    r2 = 2 * rank
    dense_threshold = min(512, max(256, 2 * _round_up(r2, _LANE)))
    use_dense = (n_lane <= dense_threshold) or (r2 >= n_lane)

    # ---- fold parameters into bf16 weights once, outside the grid --------------------
    au = a[:, None] * u
    av = a[:, None] * v
    if use_dense:
        w = (u.T @ av - v.T @ au).astype(compute_dtype)                 # (n, n) skew
        weights = (w,)
        w_rows = _round_up(n, _sublane_pack(compute_dtype))
        weight_vmem = 2 * w_rows * n_lane * cmp_isz                     # both pipeline buffers
        w_specs = [pl.BlockSpec((n, n), lambda i: (0, 0))]
        kernel = _lie_residual_dense_kernel
    else:
        uv = jnp.concatenate([u, v], axis=0).astype(compute_dtype)      # (2r, n) lane-dense
        w2 = jnp.concatenate([av, -au], axis=0).astype(compute_dtype)   # (2r, n) lane-dense
        weights = (uv, w2)
        w_rows = _round_up(r2, _sublane_pack(compute_dtype))
        weight_vmem = 2 * 2 * w_rows * n_lane * cmp_isz
        w_specs = [pl.BlockSpec((r2, n), lambda i: (0, 0)),
                   pl.BlockSpec((r2, n), lambda i: (0, 0))]
        kernel = _lie_residual_lowrank_kernel

    # ---- row tile: as large as genuinely fits (chip-queried VMEM capacity) -----------
    vmem_cap = _vmem_capacity_bytes()
    vmem_limit = min(vmem_cap - (2 << 20), int(vmem_cap * 0.90))
    vmem_budget = int(vmem_limit * 0.85)
    # per row: double-buffered x + out blocks, f32 update, bf16 cast of x, f32 proj.
    bytes_per_row = n_lane * (4 * in_isz + 4 + cmp_isz) + 4 * _LANE
    tm_cap = max(pack, (vmem_budget - weight_vmem) // bytes_per_row)
    tm = min(_MAX_ROW_TILE, tm_cap, _round_up(m, pack))
    tm = max(pack, (tm // pack) * pack)

    steps = _cdiv(m, tm)
    # Prefer an even number of grid steps (>2) so v7x's two TensorCores split the
    # "parallel" row axis evenly; near-free on single-TC v5e/v6e.  Single-step grids
    # are left alone (splitting them is pure overhead on 1-TC chips).
    if steps > 2 and steps % 2 == 1:
        tm_even = _round_up(_cdiv(m, steps + 1), pack)
        if pack <= tm_even < tm:
            tm = tm_even
            steps = _cdiv(m, tm)
    grid = (steps,)

    out = pl.pallas_call(
        kernel,
        out_shape=jax.ShapeDtypeStruct((m, n), dtype),
        grid_spec=pltpu.PrefetchScalarGridSpec(
            num_scalar_prefetch=0,
            grid=grid,
            in_specs=[pl.BlockSpec((tm, n), lambda i: (i, 0))] + w_specs,
            out_specs=pl.BlockSpec((tm, n), lambda i: (i, 0)),
        ),
        compiler_params=pltpu.CompilerParams(
            dimension_semantics=("parallel",),
            vmem_limit_bytes=vmem_limit,
        ),
    )(x2, *weights)

    return out.reshape(orig_shape)


def lie_residual_ref(x, u, v, a):
    """Plain-JAX reference matching the PyTorch forward."""
    u_x = jnp.einsum('rn,...n->...r', u, x)
    v_x = jnp.einsum('rn,...n->...r', v, x)
    upd = (jnp.einsum('r,...r,rn->...n', a, u_x, v)
           - jnp.einsum('r,...r,rn->...n', a, v_x, u))
    return x + upd


if __name__ == "__main__":
    # Small shapes consistent with the module: batch=2, seq=8, n=32, rank=4.
    n = 32
    rank = 4
    key = jax.random.PRNGKey(0)
    kx, ku, kv, ka = jax.random.split(key, 4)

    x = jax.random.normal(kx, (2, 8, n), dtype=jnp.float32)
    u = jax.random.normal(ku, (rank, n), dtype=jnp.float32) / math.sqrt(n)
    v = jax.random.normal(kv, (rank, n), dtype=jnp.float32) / math.sqrt(n)
    # nn.init is zeros for `a`; use small random values so the update path is exercised.
    a = 0.1 * jax.random.normal(ka, (rank,), dtype=jnp.float32)

    out = jax.block_until_ready(lie_residual(x, u, v, a))
    ref = lie_residual_ref(x, u, v, a)
    assert out.shape == x.shape
    # bf16 matmul operands => relaxed tolerance (only the small update term is affected)
    assert jnp.allclose(out, ref, atol=2e-2, rtol=2e-2), float(jnp.max(jnp.abs(out - ref)))

    # Also exercise the low-rank (larger-n) path and a ragged row count.
    n2 = 384
    x2 = jax.random.normal(kx, (3, 7, n2), dtype=jnp.float32)   # m = 21 (not a tile multiple)
    u2 = jax.random.normal(ku, (rank, n2), dtype=jnp.float32) / math.sqrt(n2)
    v2 = jax.random.normal(kv, (rank, n2), dtype=jnp.float32) / math.sqrt(n2)
    out2 = jax.block_until_ready(lie_residual(x2, u2, v2, a))
    ref2 = lie_residual_ref(x2, u2, v2, a)
    assert out2.shape == x2.shape
    assert jnp.allclose(out2, ref2, atol=2e-2, rtol=2e-2), float(jnp.max(jnp.abs(out2 - ref2)))

    print("KERNEL_OK")
</pallas_src>

<mosaic_0001>
module attributes {stable_mosaic.version = 11 : i64} {
  func.func @_lie_residual_dense_kernel(%arg0: i32, %arg1: memref<16x32xf32, #tpu.memory_space<vmem>>, %arg2: memref<32x32xbf16, #tpu.memory_space<vmem>>, %arg3: memref<16x32xf32, #tpu.memory_space<vmem>>) attributes {dimension_semantics = [#tpu.dimension_semantics<parallel>], iteration_bounds = array<i64: 1>, scalar_prefetch = 0 : i64, scratch_operands = 0 : i64, tpu.core_type = #tpu.core_type<tc>, window_params = [{transform_indices = @transform_0, window_bounds = array<i64: 16, 32>}, {pipeline_mode = #tpu.pipeline_mode<synchronous>, transform_indices = @transform_1, window_bounds = array<i64: 32, 32>}, {transform_indices = @transform_2, window_bounds = array<i64: 16, 32>}]} {
    %c0 = arith.constant 0 : index
    %c0_0 = arith.constant 0 : index
    %0 = vector.load %arg1[%c0, %c0_0] : memref<16x32xf32, #tpu.memory_space<vmem>>, vector<16x32xf32>
    %1 = arith.truncf %0 : vector<16x32xf32> to vector<16x32xbf16>
    %c0_1 = arith.constant 0 : index
    %c0_2 = arith.constant 0 : index
    %2 = vector.load %arg2[%c0_1, %c0_2] : memref<32x32xbf16, #tpu.memory_space<vmem>>, vector<32x32xbf16>
    %cst = arith.constant dense<0.000000e+00> : vector<16x32xf32>
    %3 = tpu.matmul %1, %2, %cst {dimension_numbers = #tpu.dot_dimension_numbers<[1], [0], [0], [1], [0, 0, 1, 1], [], []>} : vector<16x32xbf16>, vector<32x32xbf16>, vector<16x32xf32> -> vector<16x32xf32>
    %4 = arith.addf %0, %3 : vector<16x32xf32>
    %c0_3 = arith.constant 0 : index
    %c0_4 = arith.constant 0 : index
    %5 = vector.load %arg3[%c0_3, %c0_4] : memref<16x32xf32, #tpu.memory_space<vmem>>, vector<16x32xf32>
    tpu.vector_store %arg3[%c0_3, %c0_4], %4 {strides = array<i32>} : memref<16x32xf32, #tpu.memory_space<vmem>>, vector<16x32xf32>,
    return
  }
  func.func @transform_0(%arg0: i32) -> (i32, i32) {
    %c0_i32 = arith.constant 0 : i32
    %c0_i32_0 = arith.constant 0 : i32
    return %arg0, %c0_i32 : i32, i32
  }
  func.func @transform_1(%arg0: i32) -> (i32, i32) {
    %c0_i32 = arith.constant 0 : i32
    %c0_i32_0 = arith.constant 0 : i32
    %c0_i32_1 = arith.constant 0 : i32
    return %c0_i32, %c0_i32_0 : i32, i32
  }
  func.func @transform_2(%arg0: i32) -> (i32, i32) {
    %c0_i32 = arith.constant 0 : i32
    %c0_i32_0 = arith.constant 0 : i32
    return %arg0, %c0_i32 : i32, i32
  }
}

</mosaic_0001>

<bundles_post_ra>
// kernel: lie_residual.1
= control target key start
LH: loop header
LB: loop body
LE: loop exit
PB: predicated region body
PF: predicated region fallthrough
CT: control target
= control target key end

     0   :  { %v140_v1 = vmov 0.0   ;;  %vm141_vm0 = vmmov 0   ;;  %s175_s0 = inlined_call_operand.vmem [shape: f32[16,32], index: 0, kind: input, shape index: {}]   ;;  %s176_s1 = inlined_call_operand.vmem [shape: bf16[32,32], index: 1, kind: input, shape index: {}]   ;;  %s177_s2 = inlined_call_operand.hbm [shape: f32[16,32], index: 2, kind: output, shape index: {}]  }
   0x1   :  { %v116_v0 = vld [vmem:[%s176_s1 + $0x8] sm:$0xff]   ;;  %103 = vmatprep.subr.bf16.mxu0 %v140_v1  ;;  %v117_v2 = vld [vmem:[%s176_s1] sm:$0xff]   ;;  %107 = vmatprep.mubr.msk.bf16.mxu0 %vm141_vm0, %v140_v1 }
   0x2   :  { %104 = vmatpush3.bf16.msra.mxu0 %v116_v0  ;;  %v13_v3 = vld [vmem:[%s175_s0] sm:$0xff]  ;;  %v14_v4 = vld [vmem:[%s175_s0 + $0x8] sm:$0xff] }
   0x3   :  { %7 = vsyncpa [#allocation3], 0  ;;  %105 = vmatprep.subr.bf16.mxu0 %v140_v1  ;;  %v15_v5 = vpack.c.bf16 %v14_v4, %v13_v3  ;;  %vm32_vm1 = vcmask 261120   ;;  %s142_s1 = smov [#allocation2]  }
   0x4   :  { %s86_s17 = sshll.u32 %s142_s1, 4  ;;  %s87_s17 = int_to_ptr.vmem [resolvable:$true] %s86_s17 }
   0x5   :  { %s118_s18 = scalar_lea.vmem %s87_s17, 256  ;;  %p123_p1 = scmp.lt.s32.totalorder %s87_s17, %s87_s17 }
   0x6   :  { %106 = vmatpush3.bf16.msra.mxu0 %v117_v2  ;;  %p119_p0 = scmp.ne.s32.totalorder %s87_s17, %s118_s18  ;;  %p124_p2 = scmp.lt.s32.totalorder %s118_s18, %s118_s18 }
   0x8   :  { %p125_p3 = por %p124_p2, %p123_p1 }
   0x9   :  { %108 = vmatmul.mubr.msk.bf16.vlgmr.msra.gmra.mxu0 %vm32_vm1, %v15_v5 }
   0xa   :  { %p126_p4 = pnand %p125_p3, %p119_p0 }
  0xc9   :  { %v70_v6 = vpop.f32.mrf.mxu0 }
  0xca   :  { %v77_v7 = vadd.f32 %v70_v6, %v13_v3 }
  0xcb   :  { %v109_v8 = vpop.f32.mrf.mxu0 }
  0xcc   :  { %79 = vst.msk [vmem:[#allocation2] sm:$0xff] %vm32_vm1, %v77_v7 }
  0xcd   :  { %v73_v9 = vpop.f32.mrf.mxu0 }
  0xce   :  { %v78_v10 = vadd.f32 %v73_v9, %v14_v4 }
  0xcf   :  { %v110_v11 = vpop.f32.mrf.mxu0 }
  0xd0   :  { %80 = vst.msk [vmem:[#allocation2 + $0x8] sm:$0xff] %vm32_vm1, %v78_v10 }
  0xd1   :  { %129 = shalt.err (!%p126_p4)
}
  0xd2   :  { %s143_s0 = smov 128   ;;  %s144_s19 = smov 8  }
  0xd3   :  { %92 = dma.vmem_to_hbm [thread:$0]  %s87_s17, 256, %s177_s2, [#allocation3], %s143_s0, %s143_s0, %s144_s19  }
  0xd4   :  { %138 = dma.done.wait [#allocation3], 256  }
  0xd5   :  { %139 = vsyncadd [#allocation3], 4294967040 }
  0xd6   :  { %96 = vsyncpa [#allocation3], 1 }

</bundles_post_ra>
